<compile_context>
chip_gen: v6e
topology: v6e:2x2x1
jax: 0.10.0
libtpu: 0.0.40
codegen_flags: <defaults>
</compile_context>

<pallas_src>
import math
import functools

import jax
import jax.numpy as jnp
from jax.experimental import pallas as pl
from jax.experimental.pallas import tpu as pltpu


def _flash_sdpa_kernel(q_ref, k_ref, v_ref, *rest, scale, with_mask):
    """One grid step == one (batch, head, query-tile, key-tile).

    q_ref    : [1, 1, tq, d_k]  bf16
    k_ref    : [1, 1, tk, d_k]  bf16
    v_ref    : [1, 1, tk, d_v]  bf16
    mask_ref : [1, 1, tq, tk]   bf16 {0,1}   (only when with_mask)
    o_ref    : [1, 1, tq, d_v]
    m_sc, l_sc : [tq, 1] f32 scratch;  acc_sc : [tq, d_v] f32 scratch
    """
    if with_mask:
        mask_ref, o_ref, m_sc, l_sc, acc_sc = rest
    else:
        mask_ref = None
        o_ref, m_sc, l_sc, acc_sc = rest

    kv = pl.program_id(3)

    @pl.when(kv == 0)
    def _():
        m_sc[...] = jnp.full(m_sc.shape, -jnp.inf, jnp.float32)
        l_sc[...] = jnp.zeros(l_sc.shape, jnp.float32)
        acc_sc[...] = jnp.zeros(acc_sc.shape, jnp.float32)

    # Fold the softmax scale into q (tq*d_k muls, not tq*tk on the scores).
    q = q_ref[0, 0] * scale            # [tq, d_k] bf16
    k = k_ref[0, 0]                    # [tk, d_k] bf16
    v = v_ref[0, 0]                    # [tk, d_v] bf16

    # scores on the MXU, f32 accumulation.
    s = jnp.einsum("qd,kd->qk", q, k,
                   preferred_element_type=jnp.float32)          # [tq, tk] f32
    if with_mask:
        s = jnp.where(mask_ref[0, 0] > 0, jnp.float32(-1e9), s)

    # Online softmax update (f32).
    m_prev = m_sc[...]
    m_new = jnp.maximum(m_prev, jnp.max(s, axis=-1, keepdims=True))
    alpha = jnp.exp(m_prev - m_new)
    p = jnp.exp(s - m_new)
    l_sc[...] = alpha * l_sc[...] + jnp.sum(p, axis=-1, keepdims=True)
    acc_sc[...] = alpha * acc_sc[...] + jnp.dot(
        p.astype(v.dtype), v, preferred_element_type=jnp.float32)
    m_sc[...] = m_new

    @pl.when(kv == pl.num_programs(3) - 1)
    def _():
        inv_l = pl.reciprocal(l_sc[...], approx=True)
        o_ref[0, 0] = (acc_sc[...] * inv_l).astype(o_ref.dtype)


def _pick_tile(total, candidates):
    for c in candidates:
        if total % c == 0:
            return c
    return total  # fall back to the full extent (always a legal block)


def scaled_dot_product_attention(Q, K, V, mask=None, *, tq=None, tk=None):
    B, H, Lq, d_k = Q.shape
    _, _, Lk, d_v = V.shape
    out_dtype = Q.dtype

    # bf16 MXU operands, cast once here (K/V tiles are re-read Lq/tq times).
    Qc = Q.astype(jnp.bfloat16)
    Kc = K.astype(jnp.bfloat16)
    Vc = V.astype(jnp.bfloat16)

    # Tile selection: second-to-last block dims must be multiples of the sublane
    # tiling (use >=16 for bf16) or the full extent; key tiles must be multiples
    # of 128 lanes or the full extent.  256-wide tiles fill the v6e/v7x MXU;
    # v5e callers may pass tq=128 explicitly.
    if tq is None:
        tq = _pick_tile(Lq, (256, 128, 64, 32, 16))
    if tk is None:
        tk = _pick_tile(Lk, (512, 256, 128))
    assert Lq % tq == 0 and Lk % tk == 0

    with_mask = mask is not None
    kernel = functools.partial(_flash_sdpa_kernel,
                               scale=1.0 / math.sqrt(d_k),
                               with_mask=with_mask)

    in_specs = [
        pl.BlockSpec((1, 1, tq, d_k), lambda b, h, qi, kv: (b, h, qi, 0)),
        pl.BlockSpec((1, 1, tk, d_k), lambda b, h, qi, kv: (b, h, kv, 0)),
        pl.BlockSpec((1, 1, tk, d_v), lambda b, h, qi, kv: (b, h, kv, 0)),
    ]
    args = [Qc, Kc, Vc]
    if with_mask:
        # bf16 {0,1} mask (half the HBM traffic of an f32 additive mask);
        # broadcast over heads via the index_map's constant 0 on the head axis.
        mask_bf16 = mask.reshape(B, 1, Lq, Lk).astype(jnp.bfloat16)
        in_specs.append(
            pl.BlockSpec((1, 1, tq, tk), lambda b, h, qi, kv: (b, 0, qi, kv)))
        args.append(mask_bf16)

    out = pl.pallas_call(
        kernel,
        out_shape=jax.ShapeDtypeStruct((B, H, Lq, d_v), out_dtype),
        grid_spec=pltpu.PrefetchScalarGridSpec(
            num_scalar_prefetch=0,
            grid=(B, H, Lq // tq, Lk // tk),
            in_specs=in_specs,
            out_specs=pl.BlockSpec((1, 1, tq, d_v),
                                   lambda b, h, qi, kv: (b, h, qi, 0)),
            scratch_shapes=[
                pltpu.VMEM((tq, 1), jnp.float32),    # running max m
                pltpu.VMEM((tq, 1), jnp.float32),    # running denom l
                pltpu.VMEM((tq, d_v), jnp.float32),  # running output acc
            ],
        ),
        compiler_params=pltpu.CompilerParams(
            dimension_semantics=("parallel", "parallel", "parallel", "arbitrary"),
            vmem_limit_bytes=32 * 1024 * 1024,
        ),
    )(*args)
    return out


def sdpa_reference(Q, K, V, mask):
    """Pure-JAX f32 reference matching the PyTorch forward (intended mask semantics)."""
    d_k = Q.shape[-1]
    scores = jnp.einsum("bhqd,bhkd->bhqk", Q, K) / math.sqrt(d_k)
    if mask is not None:
        scores = jnp.where(mask, -1e9, scores)   # [B,1,Lq,Lk] broadcast over heads
    attn = jax.nn.softmax(scores, axis=-1)
    return jnp.einsum("bhqk,bhkd->bhqd", attn, V)


if __name__ == "__main__":
    key = jax.random.PRNGKey(0)
    kq, kk, kv_ = jax.random.split(key, 3)

    # Pre-round inputs to bf16-representable f32 values so the f32 reference
    # isolates the kernel's algorithm from the (intended) bf16 operand cast.
    def rnd(k, shape):
        x = jax.random.normal(k, shape, jnp.float32)
        return x.astype(jnp.bfloat16).astype(jnp.float32)

    # --- Small module-shaped test: B=2, H=4, Lq=Lk=32, d_k=d_v=64 ---------------
    B, H, Lq, Lk, d_k, d_v = 2, 4, 32, 32, 64, 64
    Q = rnd(kq, (B, H, Lq, d_k))
    K = rnd(kk, (B, H, Lk, d_k))
    V = rnd(kv_, (B, H, Lk, d_v))

    # Key-padding style mask [B, 1, Lq, Lk]: mask the last 8 key positions of batch 1.
    mask = jnp.zeros((B, 1, Lq, Lk), dtype=jnp.bool_)
    mask = mask.at[1, 0, :, Lk - 8:].set(True)

    out = jax.block_until_ready(scaled_dot_product_attention(Q, K, V, mask))
    ref = sdpa_reference(Q, K, V, mask)
    assert out.shape == (B, H, Lq, d_v)
    assert jnp.allclose(out, ref, atol=2e-2, rtol=2e-2), "masked mismatch vs reference"

    out_nm = jax.block_until_ready(scaled_dot_product_attention(Q, K, V, None))
    ref_nm = sdpa_reference(Q, K, V, None)
    assert jnp.allclose(out_nm, ref_nm, atol=2e-2, rtol=2e-2), "no-mask mismatch vs reference"

    # --- Multi-tile test exercising the online-softmax accumulation path --------
    B2, H2, L2, d2 = 1, 2, 256, 64
    kq2, kk2, kv2 = jax.random.split(jax.random.PRNGKey(1), 3)
    Q2 = rnd(kq2, (B2, H2, L2, d2))
    K2 = rnd(kk2, (B2, H2, L2, d2))
    V2 = rnd(kv2, (B2, H2, L2, d2))
    mask2 = jnp.zeros((B2, 1, L2, L2), dtype=jnp.bool_)
    mask2 = mask2.at[0, 0, :, 200:].set(True)

    out2 = jax.block_until_ready(
        scaled_dot_product_attention(Q2, K2, V2, mask2, tq=128, tk=128))
    ref2 = sdpa_reference(Q2, K2, V2, mask2)
    assert jnp.allclose(out2, ref2, atol=2e-2, rtol=2e-2), "flash-path mismatch vs reference"

    print("KERNEL_OK")
</pallas_src>

<mosaic_0001>
module attributes {stable_mosaic.version = 11 : i64} {
  func.func @_flash_sdpa_kernel(%arg0: i32, %arg1: i32, %arg2: i32, %arg3: i32, %arg4: memref<1x1x32x64xbf16, #tpu.memory_space<vmem>>, %arg5: memref<1x1x32x64xbf16, #tpu.memory_space<vmem>>, %arg6: memref<1x1x32x64xbf16, #tpu.memory_space<vmem>>, %arg7: memref<1x1x32x32xbf16, #tpu.memory_space<vmem>>, %arg8: memref<1x1x32x64xf32, #tpu.memory_space<vmem>>, %arg9: memref<32x1xf32, #tpu.memory_space<vmem>>, %arg10: memref<32x1xf32, #tpu.memory_space<vmem>>, %arg11: memref<32x64xf32, #tpu.memory_space<vmem>>) attributes {dimension_semantics = [#tpu.dimension_semantics<parallel>, #tpu.dimension_semantics<parallel>, #tpu.dimension_semantics<parallel>, #tpu.dimension_semantics<arbitrary>], iteration_bounds = array<i64: 2, 4, 1, 1>, scalar_prefetch = 0 : i64, scratch_operands = 3 : i64, tpu.core_type = #tpu.core_type<tc>, window_params = [{transform_indices = @transform_0, window_bounds = array<i64: 1, 1, 32, 64>}, {transform_indices = @transform_1, window_bounds = array<i64: 1, 1, 32, 64>}, {transform_indices = @transform_2, window_bounds = array<i64: 1, 1, 32, 64>}, {transform_indices = @transform_3, window_bounds = array<i64: 1, 1, 32, 32>}, {transform_indices = @transform_4, window_bounds = array<i64: 1, 1, 32, 64>}]} {
    %c0_i32 = arith.constant 0 : i32
    %0 = arith.cmpi eq, %arg3, %c0_i32 : i32
    %1 = arith.extui %0 : i1 to i32
    %c0_i32_0 = arith.constant 0 : i32
    %2 = arith.cmpi ne, %1, %c0_i32_0 : i32
    scf.if %2 {
      %cst_36 = arith.constant 0xFF800000 : f32
      %44 = vector.broadcast %cst_36 : f32 to vector<32x1xf32>
      %c0_37 = arith.constant 0 : index
      %c0_38 = arith.constant 0 : index
      %45 = vector.load %arg9[%c0_37, %c0_38] : memref<32x1xf32, #tpu.memory_space<vmem>>, vector<32x1xf32>
      tpu.vector_store %arg9[%c0_37, %c0_38], %44 {strides = array<i32>} : memref<32x1xf32, #tpu.memory_space<vmem>>, vector<32x1xf32>,
      %cst_39 = arith.constant 0.000000e+00 : f32
      %46 = vector.broadcast %cst_39 : f32 to vector<32x1xf32>
      %c0_40 = arith.constant 0 : index
      %c0_41 = arith.constant 0 : index
      %47 = vector.load %arg10[%c0_40, %c0_41] : memref<32x1xf32, #tpu.memory_space<vmem>>, vector<32x1xf32>
      tpu.vector_store %arg10[%c0_40, %c0_41], %46 {strides = array<i32>} : memref<32x1xf32, #tpu.memory_space<vmem>>, vector<32x1xf32>,
      %cst_42 = arith.constant 0.000000e+00 : f32
      %48 = vector.broadcast %cst_42 : f32 to vector<32x64xf32>
      %c0_43 = arith.constant 0 : index
      %c0_44 = arith.constant 0 : index
      %49 = vector.load %arg11[%c0_43, %c0_44] : memref<32x64xf32, #tpu.memory_space<vmem>>, vector<32x64xf32>
      tpu.vector_store %arg11[%c0_43, %c0_44], %48 {strides = array<i32>} : memref<32x64xf32, #tpu.memory_space<vmem>>, vector<32x64xf32>,
    } else {
    }
    %c0 = arith.constant 0 : index
    %c0_1 = arith.constant 0 : index
    %c0_2 = arith.constant 0 : index
    %c0_3 = arith.constant 0 : index
    %3 = vector.load %arg4[%c0, %c0_1, %c0_2, %c0_3] : memref<1x1x32x64xbf16, #tpu.memory_space<vmem>>, vector<1x1x32x64xbf16>
    %4 = vector.shape_cast %3 : vector<1x1x32x64xbf16> to vector<32x64xbf16>
    %cst = arith.constant 1.250000e-01 : bf16
    %5 = vector.broadcast %cst : bf16 to vector<32x64xbf16>
    %6 = arith.mulf %4, %5 : vector<32x64xbf16>
    %c0_4 = arith.constant 0 : index
    %c0_5 = arith.constant 0 : index
    %c0_6 = arith.constant 0 : index
    %c0_7 = arith.constant 0 : index
    %7 = vector.load %arg5[%c0_4, %c0_5, %c0_6, %c0_7] : memref<1x1x32x64xbf16, #tpu.memory_space<vmem>>, vector<1x1x32x64xbf16>
    %8 = vector.shape_cast %7 : vector<1x1x32x64xbf16> to vector<32x64xbf16>
    %c0_8 = arith.constant 0 : index
    %c0_9 = arith.constant 0 : index
    %c0_10 = arith.constant 0 : index
    %c0_11 = arith.constant 0 : index
    %9 = vector.load %arg6[%c0_8, %c0_9, %c0_10, %c0_11] : memref<1x1x32x64xbf16, #tpu.memory_space<vmem>>, vector<1x1x32x64xbf16>
    %10 = vector.shape_cast %9 : vector<1x1x32x64xbf16> to vector<32x64xbf16>
    "tpu.trace_start"() <{level = 10 : i32, message = "qd,kd->qk"}> : () -> ()
    %cst_12 = arith.constant dense<0.000000e+00> : vector<32x32xf32>
    %11 = tpu.matmul %6, %8, %cst_12 {dimension_numbers = #tpu.dot_dimension_numbers<[1], [1], [0], [0], [0, 0, 1, 0], [], []>} : vector<32x64xbf16>, vector<32x64xbf16>, vector<32x32xf32> -> vector<32x32xf32>
    "tpu.trace_stop"() : () -> ()
    %c0_13 = arith.constant 0 : index
    %c0_14 = arith.constant 0 : index
    %c0_15 = arith.constant 0 : index
    %c0_16 = arith.constant 0 : index
    %12 = vector.load %arg7[%c0_13, %c0_14, %c0_15, %c0_16] : memref<1x1x32x32xbf16, #tpu.memory_space<vmem>>, vector<1x1x32x32xbf16>
    %13 = vector.shape_cast %12 : vector<1x1x32x32xbf16> to vector<32x32xbf16>
    %cst_17 = arith.constant 0.000000e+00 : bf16
    %14 = vector.broadcast %cst_17 : bf16 to vector<32x32xbf16>
    %15 = arith.cmpf ogt, %13, %14 : vector<32x32xbf16>
    %cst_18 = arith.constant -1.000000e+09 : f32
    %16 = vector.broadcast %cst_18 : f32 to vector<32x32xf32>
    %17 = arith.select %15, %16, %11 : vector<32x32xi1>, vector<32x32xf32>
    %c0_19 = arith.constant 0 : index
    %c0_20 = arith.constant 0 : index
    %18 = vector.load %arg9[%c0_19, %c0_20] : memref<32x1xf32, #tpu.memory_space<vmem>>, vector<32x1xf32>
    %cst_21 = arith.constant dense<0xFF800000> : vector<32xf32>
    %19 = vector.multi_reduction <maximumf>, %17, %cst_21 [1] : vector<32x32xf32> to vector<32xf32>
    %20 = vector.shape_cast %19 : vector<32xf32> to vector<32x1xf32>
    %21 = arith.maximumf %18, %20 : vector<32x1xf32>
    %22 = arith.subf %18, %21 : vector<32x1xf32>
    %23 = math.exp %22 : vector<32x1xf32>
    %24 = vector.broadcast %21 : vector<32x1xf32> to vector<32x32xf32>
    %25 = arith.subf %17, %24 : vector<32x32xf32>
    %26 = math.exp %25 : vector<32x32xf32>
    %c0_22 = arith.constant 0 : index
    %c0_23 = arith.constant 0 : index
    %27 = vector.load %arg10[%c0_22, %c0_23] : memref<32x1xf32, #tpu.memory_space<vmem>>, vector<32x1xf32>
    %28 = arith.mulf %23, %27 : vector<32x1xf32>
    %cst_24 = arith.constant dense<0.000000e+00> : vector<32xf32>
    %29 = vector.multi_reduction <add>, %26, %cst_24 [1] : vector<32x32xf32> to vector<32xf32>
    %30 = vector.shape_cast %29 : vector<32xf32> to vector<32x1xf32>
    %31 = arith.addf %28, %30 : vector<32x1xf32>
    %c0_25 = arith.constant 0 : index
    %c0_26 = arith.constant 0 : index
    %32 = vector.load %arg10[%c0_25, %c0_26] : memref<32x1xf32, #tpu.memory_space<vmem>>, vector<32x1xf32>
    tpu.vector_store %arg10[%c0_25, %c0_26], %31 {strides = array<i32>} : memref<32x1xf32, #tpu.memory_space<vmem>>, vector<32x1xf32>,
    %c0_27 = arith.constant 0 : index
    %c0_28 = arith.constant 0 : index
    %33 = vector.load %arg11[%c0_27, %c0_28] : memref<32x64xf32, #tpu.memory_space<vmem>>, vector<32x64xf32>
    %34 = vector.broadcast %23 : vector<32x1xf32> to vector<32x64xf32>
    %35 = arith.mulf %34, %33 : vector<32x64xf32>
    %36 = arith.truncf %26 : vector<32x32xf32> to vector<32x32xbf16>
    %cst_29 = arith.constant dense<0.000000e+00> : vector<32x64xf32>
    %37 = tpu.matmul %36, %10, %cst_29 {dimension_numbers = #tpu.dot_dimension_numbers<[1], [0], [0], [1], [0, 0, 1, 1], [], []>} : vector<32x32xbf16>, vector<32x64xbf16>, vector<32x64xf32> -> vector<32x64xf32>
    %38 = arith.addf %35, %37 : vector<32x64xf32>
    %c0_30 = arith.constant 0 : index
    %c0_31 = arith.constant 0 : index
    %39 = vector.load %arg11[%c0_30, %c0_31] : memref<32x64xf32, #tpu.memory_space<vmem>>, vector<32x64xf32>
    tpu.vector_store %arg11[%c0_30, %c0_31], %38 {strides = array<i32>} : memref<32x64xf32, #tpu.memory_space<vmem>>, vector<32x64xf32>,
    %c0_32 = arith.constant 0 : index
    %c0_33 = arith.constant 0 : index
    %40 = vector.load %arg9[%c0_32, %c0_33] : memref<32x1xf32, #tpu.memory_space<vmem>>, vector<32x1xf32>
    tpu.vector_store %arg9[%c0_32, %c0_33], %21 {strides = array<i32>} : memref<32x1xf32, #tpu.memory_space<vmem>>, vector<32x1xf32>,
    %c0_i32_34 = arith.constant 0 : i32
    %41 = arith.cmpi eq, %arg3, %c0_i32_34 : i32
    %42 = arith.extui %41 : i1 to i32
    %c0_i32_35 = arith.constant 0 : i32
    %43 = arith.cmpi ne, %42, %c0_i32_35 : i32
    scf.if %43 {
      %c0_36 = arith.constant 0 : index
      %c0_37 = arith.constant 0 : index
      %44 = vector.load %arg10[%c0_36, %c0_37] : memref<32x1xf32, #tpu.memory_space<vmem>>, vector<32x1xf32>
      %45 = tpu.reciprocal %44 {approx = true} : vector<32x1xf32> -> vector<32x1xf32>
      %c0_38 = arith.constant 0 : index
      %c0_39 = arith.constant 0 : index
      %46 = vector.load %arg11[%c0_38, %c0_39] : memref<32x64xf32, #tpu.memory_space<vmem>>, vector<32x64xf32>
      %47 = vector.broadcast %45 : vector<32x1xf32> to vector<32x64xf32>
      %48 = arith.mulf %46, %47 : vector<32x64xf32>
      %c0_40 = arith.constant 0 : index
      %c0_41 = arith.constant 0 : index
      %c0_42 = arith.constant 0 : index
      %c0_43 = arith.constant 0 : index
      %49 = vector.load %arg8[%c0_40, %c0_41, %c0_42, %c0_43] : memref<1x1x32x64xf32, #tpu.memory_space<vmem>>, vector<1x1x32x64xf32>
      %50 = vector.shape_cast %49 : vector<1x1x32x64xf32> to vector<32x64xf32>
      %51 = vector.shape_cast %48 : vector<32x64xf32> to vector<1x1x32x64xf32>
      tpu.vector_store %arg8[%c0_40, %c0_41, %c0_42, %c0_43], %51 {strides = array<i32>} : memref<1x1x32x64xf32, #tpu.memory_space<vmem>>, vector<1x1x32x64xf32>,
    } else {
    }
    return
  }
  func.func @transform_0(%arg0: i32, %arg1: i32, %arg2: i32, %arg3: i32) -> (i32, i32, i32, i32) {
    %c0_i32 = arith.constant 0 : i32
    %c0_i32_0 = arith.constant 0 : i32
    return %arg0, %arg1, %arg2, %c0_i32 : i32, i32, i32, i32
  }
  func.func @transform_1(%arg0: i32, %arg1: i32, %arg2: i32, %arg3: i32) -> (i32, i32, i32, i32) {
    %c0_i32 = arith.constant 0 : i32
    %c0_i32_0 = arith.constant 0 : i32
    return %arg0, %arg1, %arg3, %c0_i32 : i32, i32, i32, i32
  }
  func.func @transform_2(%arg0: i32, %arg1: i32, %arg2: i32, %arg3: i32) -> (i32, i32, i32, i32) {
    %c0_i32 = arith.constant 0 : i32
    %c0_i32_0 = arith.constant 0 : i32
    return %arg0, %arg1, %arg3, %c0_i32 : i32, i32, i32, i32
  }
  func.func @transform_3(%arg0: i32, %arg1: i32, %arg2: i32, %arg3: i32) -> (i32, i32, i32, i32) {
    %c0_i32 = arith.constant 0 : i32
    %c0_i32_0 = arith.constant 0 : i32
    return %arg0, %c0_i32, %arg2, %arg3 : i32, i32, i32, i32
  }
  func.func @transform_4(%arg0: i32, %arg1: i32, %arg2: i32, %arg3: i32) -> (i32, i32, i32, i32) {
    %c0_i32 = arith.constant 0 : i32
    %c0_i32_0 = arith.constant 0 : i32
    return %arg0, %arg1, %arg2, %c0_i32 : i32, i32, i32, i32
  }
}

</mosaic_0001>

<bundles_post_ra>
// kernel: tpu_custom_call.1
= control target key start
LH: loop header
LB: loop body
LE: loop exit
PB: predicated region body
PF: predicated region fallthrough
CT: control target
= control target key end

     0   :  { %s1870_s0 = inlined_call_operand.hbm [shape: bf16[2,4,32,64], index: 0, kind: input, shape index: {}]   ;;  %s1871_s1 = inlined_call_operand.hbm [shape: bf16[2,4,32,64], index: 1, kind: input, shape index: {}]   ;;  %s1872_s2 = inlined_call_operand.hbm [shape: bf16[2,4,32,64], index: 2, kind: input, shape index: {}]   ;;  %s1873_s3 = inlined_call_operand.hbm [shape: bf16[2,1,32,32], index: 3, kind: input, shape index: {}]   ;;  %s1874_s4 = inlined_call_operand.hbm [shape: f32[2,4,32,64], index: 4, kind: output, shape index: {}]  }
   0x1   :  { %1889 = sst [smem:[#allocation26_spill]] %s1871_s1 }
   0x2   :  { %1890 = sst [smem:[#allocation27_spill]] %s1873_s3 }
   0x3   :  { %1891 = sst [smem:[#allocation28_spill]] %s1874_s4 }
   0x4   :  { %9 = vsyncpa [#allocation6], 0 }
   0x5   :  { %11 = vsyncpa [#allocation6 + $0x1], 0 }
   0x6   :  { %12 = vsyncpa [#allocation9], 0 }
   0x7   :  { %14 = vsyncpa [#allocation9 + $0x1], 0 }
   0x8   :  { %15 = vsyncpa [#allocation12], 0 }
   0x9   :  { %17 = vsyncpa [#allocation12 + $0x1], 0 }
   0xa   :  { %18 = vsyncpa [#allocation7], 0 }
   0xb   :  { %20 = vsyncpa [#allocation7 + $0x1], 0  ;;  %s1488_s15 = smov 0   ;;  %s1490_s16 = smov 0  }
   0xc   :  { %s1492_s17 = smov 0   ;;  %s1494_s18 = smov 0  }
   0xd   :  { %s1496_s19 = smov 0   ;;  %s1498_s20 = smov 0  }
   0xe   :  { %s1500_s21 = smov 0   ;;  %s1502_s22 = smov 0  }
   0xf   :  { %s1504_s23 = smov 0   ;;  %s1506_s24 = smov 0  }
  0x10   :  { %s1508_s25 = smov 0  }
  0x11 LB: > { %1892 = sst [smem:[#allocation18_spill]] %s1433_s21  ;;  %s1544_s26 = sadd.s32 4294967295, %s1449_s25   ;;  %s1449_s25 = sphi %s1508_s25, %s26_s25   ;;  %s1445_s24 = sphi %s1506_s24, %s1933_s24   ;;  %s1441_s23 = sphi %s1504_s23, %s1924_s23   ;;  %s1437_s22 = sphi %s1502_s22, %s1932_s22   ;;  %s1433_s21 = sphi %s1500_s21, %s1923_s21   ;;  %s1429_s20 = sphi %s1498_s20, %s1931_s20   ;;  %s1425_s19 = sphi %s1496_s19, %s1930_s19   ;;  %s1421_s18 = sphi %s1494_s18, %s1929_s18   ;;  %s1417_s17 = sphi %s1492_s17, %s1928_s17   ;;  %s1413_s16 = sphi %s1490_s16, %s1927_s16   ;;  %s1409_s15 = sphi %s1488_s15, %s1926_s15  }
  0x12   : > { %1893 = sst [smem:[#allocation19_spill]] %s1437_s22  ;;  %s988_s27 = sadd.s32 4294967294, %s1449_s25  }
  0x13   : > { %1894 = sst [smem:[#allocation20_spill]] %s1441_s23  ;;  %s48_s28 = sadd.s32 1, %s1441_s23 }
  0x14   : > { %s52_s29 = sadd.s32 1, %s1445_s24  ;;  %p50_p0 = scmp.ge.s32.totalorder %s48_s28, 4 }
  0x15   : > { %s63_s30 = sadd.s32 1, %s1429_s20  ;;  %p70_p1 = scmp.ne.s32.totalorder %s1429_s20, %s1425_s19 }
  0x16   : > { %p1881_p2 = scmp.eq.s32.totalorder %s1449_s25, 0  ;;  %s1935_s28 = smov (%p50_p0, %s48_s28), 0 }
  0x17   : > { %1895 = sst [smem:[#allocation21_spill]] %s1935_s28  ;;  %s1937_s29 = smov (!%p50_p0, %s52_s29), %s1445_s24 }
  0x18   : > { %s57_s5 = ssub.s32 %s1441_s23, %s1935_s28  ;;  %p1560_p3 = por %p1881_p2, %p70_p1 }
  0x19   : > { %p54_p4 = scmp.ge.s32.totalorder %s1937_s29, 2  ;;  %p1882_p5 = scmp.ne.s32.totalorder %s1425_s19, %s1421_s18 }
  0x1a   : > { %p194_p6 = scmp.eq.s32.totalorder %s1544_s26, 7  ;;  %p200_p7 = scmp.eq.s32.totalorder %s988_s27, 7 }
  0x1b   : > { %s1939_s29 = smov (%p54_p4, %s1937_s29), 0  ;;  %p1880_p12 = scmp.lt.s32.totalorder %s1449_s25, 8 }
  0x1c   : > { %1897 = sst [smem:[#allocation22_spill]] %s1939_s29  ;;  %p1569_p8 = por %p194_p6, %p70_p1 }
  0x1d   : > { %p1576_p9 = por %p200_p7, %p1882_p5  ;;  %s1582_s9 = ssub.s32 %s1445_s24, %s1939_s29 }
  0x1e   : > { %s1898_s7 = scalar_select %p1569_p8, 1, 0 }
  0x1f   : > { %s1900_s8 = scalar_select %p1576_p9, 1, 0 }
  0x20   : > { %1899 = sst [smem:[#allocation23_spill]] %s1898_s7  ;;  %s58_s10 = sor.u32 %s57_s5, %s1582_s9 }
  0x21   : > { %1901 = sst [smem:[#allocation24_spill]] %s1900_s8  ;;  %p151_p10 = scmp.eq.s32.totalorder %s1582_s9, 0 }
  0x22   : > { %p61_p11 = scmp.eq.s32.totalorder %s58_s10, 0  ;;  %s1878_s11 = sand.u32 1, %s1429_s20  }
  0x23   : > { %s992_s12 = sshll.u32 %s1441_s23, 2  ;;  %s1594_s14 = sshll.u32 %s1878_s11, 4 }
  0x24   : > { %s1590_s13 = scalar_select %p61_p11, %s1429_s20, %s63_s30  }
  0x25   : > { %s993_s27 = sshll.u32 %s1445_s24, 4  ;;  %p1601_p13 = pnand %p1880_p12, %p1560_p3 }
  0x26   : > { %1902 = sst [smem:[#allocation25_spill]] %s1590_s13  ;;  %s232_s28 = sadd.s32 %s993_s27, %s992_s12 }
  0x27   : > { %s1605_s5 = sshll.u32 %s232_s28, 6  ;;  %s245_s10 = sand.u32 1, %s1449_s25  }
  0x28   : > { %s1904_s1 = sld [smem:[#allocation26_spill]]  ;;  %s249_s13 = scalar_lea.vmem [#allocation8], %s1594_s14 }
  0x29   : > { %s260_s8 = sshll.u32 %s249_s13, 4  ;;  %p1006_p0 = scmp.ge.s32.totalorder %s1449_s25, 1  ;;  %s261_s8 = int_to_ptr.vmem [resolvable:$true] %s260_s8 }
  0x2a   : > { %p317_p1 = scmp.lt.s32.totalorder %s1449_s25, 9  ;;  %s1615_s6 = scalar_lea.sflag [#allocation9], %s245_s10 }
  0x2b   : > { %p1211_p3 = pneg %p1601_p13  ;;  %s1222_s12 = scalar_lea.vmem %s261_s8, 256 }
  0x2c   : > { %p1223_p4 = scmp.ne.s32.totalorder %s261_s8, %s1222_s12  ;;  %s1451_s28 = smov [#allocation8]  }
  0x2d   : > { %s1227_s27 = sshll.u32 %s1451_s28, 4  ;;  %s1228_s27 = int_to_ptr.vmem [resolvable:$false] %s1227_s27 }
  0x2e   : > { %s259_s11 = scalar_lea.hbm %s1904_s1, %s1605_s5  ;;  %p1225_p6 = pnand %p1223_p4, %p1211_p3 }
  0x2f   : > { %s1229_s23 = scalar_lea.vmem %s1228_s27, 512  ;;  %p1230_p11 = scmp.lt.s32.totalorder %s261_s8, %s1228_s27 }
  0x30   : > { %p1226_p7 = pneg %p1225_p6  ;;  %p1231_p12 = scmp.lt.s32.totalorder %s1229_s23, %s1222_s12 }
  0x32   : > { %p1232_p2 = por %p1231_p12, %p1230_p11 }
  0x34   : > { %p1233_p5 = pnand %p1232_p2, %p1226_p7 }
  0x36   : > { %1236 = shalt.err (!%p1233_p5)
}
  0x37   : > { %s1886_s13 = smov 64   ;;  %s1453_s10 = smov 4  }
  0x38   : > { %1071 = dma.hbm_to_vmem [thread:$0]  (!%p1601_p13), %s259_s11, 256, %s261_s8, %s1615_s6, %s1886_s13, %s1886_s13, %s1453_s10  }
  0x39   : > { %p1632_p2 = pnand %p1006_p0, %p317_p1  ;;  %s234_s27 = scalar_lea.hbm %s1870_s0, %s1605_s5 }
  0x3a   : > { %s224_s23 = scalar_lea.vmem [#allocation5], %s1594_s14  ;;  %s284_s22 = scalar_lea.hbm %s1872_s2, %s1605_s5 }
  0x3b   : > { %s235_s1 = sshll.u32 %s224_s23, 4  ;;  %s1906_s21 = sand.u32 1, %s1429_s20   ;;  %s236_s1 = int_to_ptr.vmem [resolvable:$true] %s235_s1 }
  0x3c   : > { %s221_s3 = scalar_lea.sflag [#allocation6], %s1906_s21  ;;  %s1250_s8 = scalar_lea.vmem %s236_s1, 256 }
  0x3d   : > { %p1251_p5 = scmp.ne.s32.totalorder %s236_s1, %s1250_s8  ;;  %s1454_s11 = smov [#allocation5]  }
  0x3e   : > { %s1255_s13 = sshll.u32 %s1454_s11, 4  ;;  %s1256_s13 = int_to_ptr.vmem [resolvable:$false] %s1255_s13 }
  0x3f   : > { %p1253_p12 = pnand %p1251_p5, %p1211_p3  ;;  %s1257_s12 = scalar_lea.vmem %s1256_s13, 512 }
  0x40   : > { %p1258_p1 = scmp.lt.s32.totalorder %s236_s1, %s1256_s13  ;;  %p1259_p4 = scmp.lt.s32.totalorder %s1257_s12, %s1250_s8 }
  0x41   : > { %p1254_p0 = pneg %p1253_p12 }
  0x42   : > { %p1260_p6 = por %p1259_p4, %p1258_p1 }
  0x44   : > { %p1261_p7 = pnand %p1260_p6, %p1254_p0 }
  0x46   : > { %1264 = shalt.err (!%p1261_p7)
}
  0x47   : > { %s1907_s4 = smov 64   ;;  %s274_s21 = scalar_lea.vmem [#allocation10], %s1594_s14 }
  0x48   : > { %1068 = dma.hbm_to_vmem [thread:$0]  (!%p1601_p13), %s234_s27, 256, %s236_s1, %s221_s3, %s1907_s4, %s1907_s4, %s1453_s10  }
  0x49   : > { %s285_s7 = sshll.u32 %s274_s21, 4  ;;  %s1455_s13 = smov [#allocation10]   ;;  %s286_s7 = int_to_ptr.vmem [resolvable:$true] %s285_s7 }
  0x4a   : > { %s1278_s28 = scalar_lea.vmem %s286_s7, 256  ;;  %s1283_s23 = sshll.u32 %s1455_s13, 4  ;;  %s1284_s23 = int_to_ptr.vmem [resolvable:$false] %s1283_s23 }
  0x4b   : > { %p1279_p11 = scmp.ne.s32.totalorder %s286_s7, %s1278_s28  ;;  %s1285_s8 = scalar_lea.vmem %s1284_s23, 512 }
  0x4c   : > { %p1286_p0 = scmp.lt.s32.totalorder %s286_s7, %s1284_s23  ;;  %p1287_p1 = scmp.lt.s32.totalorder %s1285_s8, %s1278_s28 }
  0x4d   : > { %p1281_p5 = pnand %p1279_p11, %p1211_p3 }
  0x4e   : > { %p1288_p4 = por %p1287_p1, %p1286_p0 }
  0x4f   : > { %p1282_p12 = pneg %p1281_p5 }
  0x51   : > { %p1289_p6 = pnand %p1288_p4, %p1282_p12 }
  0x53   : > { %1292 = shalt.err (!%p1289_p6)
}
  0x54   : > { %1074 = dma.hbm_to_vmem [thread:$0]  (!%p1601_p13), %s284_s22, 256, %s286_s7, %s1615_s6, %s1907_s4, %s1907_s4, %s1453_s10  }
  0x55   : > { %p77_p3 = scmp.eq.s32.totalorder %s1544_s26, 0  ;;  %s153_s29 = sadd.s32 1, %s1417_s17 }
  0x56   : > { %s1675_s14 = scalar_select %p151_p10, %s1417_s17, %s153_s29  }
  0x57   : > { %p1908_p7 = scmp.ne.s32.totalorder %s1425_s19, %s1421_s18  ;;  %p160_p5 = scmp.ne.s32.totalorder %s1417_s17, %s1413_s16 }
  0x58   : > { %p166_p12 = scmp.ne.s32.totalorder %s1413_s16, %s1409_s15  ;;  %s295_s27 = sand.u32 1, %s1417_s17  }
  0x59   : > { %p1680_p11 = por %p77_p3, %p1908_p7  ;;  %p1910_p0 = scmp.eq.s32.totalorder %s1449_s25, 0 }
  0x5a   : > { %p1691_p4 = por %p166_p12, %p77_p3  ;;  %s1003_s22 = sshll.u32 %s295_s27, 4 }
  0x5b   : > { %p162_p1 = por %p160_p5, %p1910_p0  ;;  %s1028_s6 = sshll.u32 %s1445_s24, 8 }
  0x5c   : > { %s1912_s21 = sld [smem:[#allocation27_spill]]  ;;  %s299_s28 = scalar_lea.vmem [#allocation11], %s1003_s22 }
  0x5d   : > { %s309_s13 = sshll.u32 %s299_s28, 4  ;;  %p1913_p10 = scmp.lt.s32.totalorder %s1449_s25, 8  ;;  %s310_s13 = int_to_ptr.vmem [resolvable:$true] %s309_s13 }
  0x5e   : > { %s296_s15 = scalar_lea.sflag [#allocation12], %s295_s27  ;;  %s1306_s8 = scalar_lea.vmem %s310_s13, 256 }
  0x5f   : > { %p1701_p13 = pnand %p1913_p10, %p162_p1  ;;  %p1307_p3 = scmp.ne.s32.totalorder %s310_s13, %s1306_s8 }
  0x60   : > { %s1456_s1 = smov [#allocation11]  }
  0x61   : > { %p1295_p6 = pneg %p1701_p13  ;;  %s1311_s3 = sshll.u32 %s1456_s1, 4  ;;  %s1312_s3 = int_to_ptr.vmem [resolvable:$false] %s1311_s3 }
  0x62   : > { %s308_s7 = scalar_lea.hbm %s1912_s21, %s1028_s6  ;;  %s1313_s29 = scalar_lea.vmem %s1312_s3, 512 }
  0x63   : > { %p1309_p7 = pnand %p1307_p3, %p1295_p6  ;;  %p1314_p12 = scmp.lt.s32.totalorder %s310_s13, %s1312_s3 }
  0x64   : > { %p1315_p0 = scmp.lt.s32.totalorder %s1313_s29, %s1306_s8 }
  0x65   : > { %p1310_p5 = pneg %p1309_p7 }
  0x66   : > { %p1316_p9 = por %p1315_p0, %p1314_p12 }
  0x68   : > { %p1317_p8 = pnand %p1316_p9, %p1310_p5 }
  0x6a   : > { %1320 = shalt.err (!%p1317_p8)
}
  0x6b   : > { %1077 = dma.hbm_to_vmem [thread:$0]  (!%p1701_p13), %s308_s7, 256, %s310_s13, %s296_s15, %s1907_s4, %s1907_s4, %s1453_s10  }
  0x6c   : > { %321 = sbr.rel (%p1632_p2) target bundleno = 928 (0x3a0), region = 36  ;;  %s1715_s27 = sand.u32 (!%p1632_p2), 1, %s1425_s19  }
  0x6d   : > { %s1718_s22 = sshll.u32 (!%p1632_p2), %s1715_s27, 4  ;;  %s324_s6 = scalar_lea.sflag (!%p1632_p2), [#allocation6], %s1715_s27 }
  0x6e   : > { %s327_s12 = scalar_lea.vmem (!%p1632_p2), [#allocation5], %s1718_s22 }
  0x71   : > { %1392 = dma.done.wait (%p1680_p11), %s324_s6, 256  }
  0x72   : > { %1394 = vsyncadd (%p1680_p11), %s324_s6, 4294967040  ;;  %s332_s10 = sand.u32 1, %s1544_s26   ;;  %s336_s4 = scalar_lea.vmem [#allocation8], %s1718_s22 }
  0x73   : > { %s333_s30 = scalar_lea.sflag [#allocation9], %s332_s10 }
  0x74   : > { %1396 = dma.done.wait (%p1680_p11), %s333_s30, 512  }
  0x75   : > { %1398 = vsyncadd (%p1680_p11), %s333_s30, 4294966784  ;;  %s350_s9 = sand.u32 1, %s1413_s16   ;;  %s345_s7 = scalar_lea.vmem [#allocation10], %s1718_s22 }
  0x76   : > { %s1010_s21 = sshll.u32 %s350_s9, 4  ;;  %s351_s28 = scalar_lea.sflag [#allocation12], %s350_s9 }
  0x77   : > { %s1734_s13 = scalar_lea.vmem [#allocation11], %s1010_s21 }
  0x78   : > { %1400 = dma.done.wait (%p1691_p4), %s351_s28, 256  }
  0x79   : > { %1402 = vsyncadd (%p1691_p4), %s351_s28, 4294967040  ;;  %vm416_vm0 = vcmask 523264   ;;  %v1181_v0 = vld [vmem:[%s336_s4 + $0x8] sm:$0xff]   ;;  %v1182_v1 = vld [vmem:[%s336_s4] sm:$0xff]   ;;  %v1457_v14 = vmov 0   ;;  %vm407_vm1 = vcmask 7168  }
  0x7a   : > { %1053 = vmatprep.subr.msk.bf16.mxu0 %vm416_vm0, %v1181_v0  ;;  %v468_v2 = vsel %vm416_vm0, %v1181_v0, 0  ;;  %v421_v3 = vld [vmem:[%s327_s12] sm:$0xf]  ;;  %v422_v4 = vld [vmem:[%s327_s12 + $0x4] sm:$0xf]  ;;  %v465_v10 = vsel %vm416_vm0, %v1182_v1, 0  ;;  %1180 = vset.pattern.permute.xlu1 %v1457_v14 }
  0x7b   : > { %1038 = vmatpush3.bf16.xpose.msra.mxu0 %v468_v2  ;;  %v425_v5 = vmul.bf16 1040203264, %v421_v3  ;;  %v426_v6 = vmul.bf16 1040203264, %v422_v4  ;;  %v423_v8 = vld [vmem:[%s327_s12 + $0x8] sm:$0xf]  ;;  %1179 = vset.pattern.permute.xlu0 %v1457_v14 }
  0x7c   : > { %1054 = vmatprep.subr.msk.bf16.mxu0 %vm416_vm0, %v1182_v1  ;;  %v424_v9 = vld [vmem:[%s327_s12 + $0xc] sm:$0xf]  ;;  %v427_v11 = vmul.bf16 1040203264, %v423_v8  ;;  %v1458_v15 = vmov -inf   ;;  %vm547_vm7 = vcmask 261120  }
  0x7d   : > { %v1012_v7 = vcombine.low %v425_v5, %v426_v6  ;;  %v428_v12 = vmul.bf16 1040203264, %v424_v9  ;;  %410 = vst.msk [vmem:[#allocation2 + $0x10] sm:$0xff] %vm407_vm1, %v1458_v15  ;;  %408 = vst.msk [vmem:[#allocation2] sm:$0xff] %vm407_vm1, %v1458_v15  ;;  %v521_v16 = vld [vmem:[%s1734_s13 + $0x8] sm:$0xf] }
  0x7e   : > { %409 = vst.msk [vmem:[#allocation2 + $0x8] sm:$0xff] %vm407_vm1, %v1458_v15  ;;  %411 = vst.msk [vmem:[#allocation2 + $0x18] sm:$0xff] %vm407_vm1, %v1458_v15  ;;  %v519_v17 = vld [vmem:[%s1734_s13] sm:$0xf]  ;;  %vm525_vm2 = vcmp.gt.bf16.partialorder %v521_v16, 0  ;;  %v1459_v40 = vmov 0.0  }
  0x7f   : > { %1041 = vmatprep.mubr.msk.bf16.mxu0 %vm416_vm0, %v1012_v7  ;;  %v1013_v13 = vcombine.low %v427_v11, %v428_v12  ;;  %v522_v18 = vld [vmem:[%s1734_s13 + $0xc] sm:$0xf]  ;;  %vm523_vm3 = vcmp.gt.bf16.partialorder %v519_v17, 0  ;;  %v529_v19 = vsel %vm525_vm2, 65537, %v1457_v14  ;;  %v520_v20 = vld [vmem:[%s1734_s13 + $0x4] sm:$0xf] }
  0x80   : > { %vm526_vm4 = vcmp.gt.bf16.partialorder %v522_v18, 0  ;;  %v527_v21 = vsel %vm523_vm3, 65537, %v1457_v14  ;;  %v533_v22 = vunpack.c.l.b16 %v529_v19  ;;  %vm524_vm5 = vcmp.gt.bf16.partialorder %v520_v20, 0  ;;  %412 = vst.msk [vmem:[#allocation3] sm:$0xff] %vm407_vm1, %v1459_v40  ;;  %413 = vst.msk [vmem:[#allocation3 + $0x8] sm:$0xff] %vm407_vm1, %v1459_v40  ;;  %v1183_v57 = vld [vmem:[%s345_s7 + $0x8] sm:$0xff]  }
  0x81   : > { %v530_v23 = vsel %vm526_vm4, 65537, %v1457_v14  ;;  %v531_v24 = vunpack.c.l.b16 %v527_v21  ;;  %v528_v25 = vsel %vm524_vm5, 65537, %v1457_v14  ;;  %414 = vst.msk [vmem:[#allocation3 + $0x10] sm:$0xff] %vm407_vm1, %v1459_v40  ;;  %415 = vst.msk [vmem:[#allocation3 + $0x18] sm:$0xff] %vm407_vm1, %v1459_v40  ;;  %1045 = vmatprep.subr.bf16.mxu1 %v1183_v57  ;;  %v1184_v58 = vld [vmem:[%s345_s7] sm:$0xff]   ;;  %s1915_s26 = sld [smem:[#allocation18_spill]] }
  0x82   : > { %vm537_vm6 = vcmp.ne.s32.totalorder %v533_v22, 0  ;;  %v534_v26 = vunpack.c.l.b16 %v530_v23  ;;  %v532_v28 = vunpack.c.l.b16 %v528_v25  ;;  %417 = vst.msk [vmem:[#allocation4] sm:$0xff] %vm416_vm0, %v1459_v40  ;;  %418 = vst.msk [vmem:[#allocation4 + $0x8] sm:$0xff] %vm416_vm0, %v1459_v40  ;;  %1046 = vmatpush3.bf16.msra.mxu1 %v1183_v57  ;;  %s1916_s5 = sld [smem:[#allocation19_spill]]  ;;  %s1011_s11 = sshll.u32 %s1715_s27, 5 }
  0x83   : > { %1040 = vmatpush3.bf16.xpose.msra.mxu0 %v465_v10  ;;  %vm535_vm8 = vcmp.ne.s32.totalorder %v531_v24, 0  ;;  %419 = vst.msk [vmem:[#allocation4 + $0x10] sm:$0xff] %vm416_vm0, %v1459_v40  ;;  %420 = vst.msk [vmem:[#allocation4 + $0x18] sm:$0xff] %vm416_vm0, %v1459_v40  ;;  %1047 = vmatprep.subr.bf16.mxu1 %v1184_v58  ;;  %s393_s1 = scalar_lea.vmem [#allocation13], %s1011_s11  ;;  %s1917_s29 = sld [smem:[#allocation23_spill]] }
  0x84   : > { %vm538_vm9 = vcmp.ne.s32.totalorder %v534_v26, 0  ;;  %vm536_vm10 = vcmp.ne.s32.totalorder %v532_v28, 0  ;;  %v1766_v41 = vld [vmem:[#allocation2 + $0x10] sm:$0xff]  ;;  %v543_v43 = vld [vmem:[#allocation2] sm:$0xff]  ;;  %s807_s3 = sshll.u32 %s393_s1, 4  ;;  %s1918_s10 = sld [smem:[#allocation28_spill]]  ;;  %s1800_s3 = int_to_ptr.vmem [resolvable:$true] %s807_s3 }
  0x85   : > { %v1769_v46 = vld [vmem:[#allocation2 + $0x18] sm:$0xff]  ;;  %v544_v50 = vld [vmem:[#allocation2 + $0x8] sm:$0xff]  ;;  %s790_s4 = scalar_lea.sflag [#allocation7], %s1715_s27  ;;  %s1321_s9 = scalar_lea.vmem %s1800_s3, 512 }
  0x86   : > { %1048 = vmatpush3.bf16.msra.mxu1 %v1184_v58  ;;  %p1322_p8 = scmp.ne.s32.totalorder %s1800_s3, %s1321_s9  ;;  %s1460_s21 = smov [#allocation13]  }
  0x87   : > { %v608_v25 = vld [vmem:[#allocation3] sm:$0xff]  ;;  %s1023_s23 = sshll.u32 %s1915_s26, 2  ;;  %s1325_s7 = sshll.u32 %s1460_s21, 4  ;;  %s1326_s7 = int_to_ptr.vmem [resolvable:$false] %s1325_s7 }
  0x88   : > { %v610_v28 = vld [vmem:[#allocation3 + $0x10] sm:$0xff]  ;;  %s1024_s15 = sshll.u32 %s1916_s5, 4  ;;  %s1327_s28 = scalar_lea.vmem %s1326_s7, 1024 }
  0x89   : > { %s804_s8 = sadd.s32 %s1024_s15, %s1023_s23  ;;  %p1919_p9 = scmp.ne.s32.totalorder %s1917_s29, 0 }
  0x8a   : > { %1042 = vmatmul.mubr.msk.bf16.vlgmr.msra.gmra.mxu0 %vm416_vm0, %v1013_v13  ;;  %s1025_s22 = sshll.u32 %s804_s8, 7  ;;  %p1328_p1 = scmp.lt.s32.totalorder %s1800_s3, %s1326_s7 }
  0x8b   : > { %s1807_s30 = scalar_lea.hbm %s1918_s10, %s1025_s22  ;;  %p1323_p2 = pnand %p1322_p8, %p1919_p9 }
  0x8c   : > { %p1329_p4 = scmp.lt.s32.totalorder %s1327_s28, %s1321_s9 }
  0x8d   : > { %p1324_p11 = pneg %p1323_p2 }
  0x8e   : > { %p1330_p10 = por %p1329_p4, %p1328_p1 }
  0x90   : > { %p1331_p13 = pnand %p1330_p10, %p1324_p11 }
 0x14a   : > { %v1043_v27 = vpop.f32.mrf.mxu0 }
 0x14b   : > { %v541_v29 = vsel %vm537_vm6, -1e+09, %v1043_v27 }
 0x14c   : > { %v504_v30 = vpop.f32.mrf.mxu0  ;;  %v554_v31 = vsel %vm547_vm7, %v541_v29, -inf }
 0x14d   : > { %v539_v32 = vsel %vm535_vm8, -1e+09, %v504_v30  ;;  %555 = vmax.xlane.f32.xlu1 %v554_v31 }
 0x14e   : > { %v1044_v33 = vpop.f32.mrf.mxu0  ;;  %v548_v34 = vsel %vm547_vm7, %v539_v32, -inf }
 0x14f   : > { %v542_v35 = vsel %vm538_vm9, -1e+09, %v1044_v33  ;;  %549 = vmax.xlane.f32.xlu0 %v548_v34 }
 0x150   : > { %v507_v36 = vpop.f32.mrf.mxu0  ;;  %v557_v37 = vsel %vm547_vm7, %v542_v35, -inf }
 0x151   : > { %v540_v38 = vsel %vm536_vm10, -1e+09, %v507_v36  ;;  %558 = vmax.xlane.f32.xlu1 %v557_v37 }
 0x152   : > { %v551_v39 = vsel %vm547_vm7, %v540_v38, -inf }
 0x153   : > { %552 = vmax.xlane.f32.xlu0 %v551_v39 }
 0x1d6   : > { %v556_v42 = vpop.xlane.xlu1 %555 }
 0x1d7   : > { %v562_v44 = vmax.f32 %v1766_v41, %v556_v42 }
 0x1d8   : > { %v550_v45 = vpop.xlane.xlu0 %549 }
 0x1d9   : > { %v566_v47 = vsub.f32 %v1766_v41, %v562_v44  ;;  %744 = vst.msk [vmem:[#allocation2 + $0x10] sm:$0xff] %vm407_vm1, %v562_v44  ;;  %v560_v48 = vmax.f32 %v543_v43, %v550_v45  ;;  %588 = vperm.xlu1 %1180, %v562_v44  }
 0x1da   : > { %v559_v49 = vpop.xlane.xlu1 %558 }
 0x1db   : > { %v564_v51 = vsub.f32 %v543_v43, %v560_v48  ;;  %742 = vst.msk [vmem:[#allocation2] sm:$0xff] %vm407_vm1, %v560_v48  ;;  %v563_v52 = vmax.f32 %v1769_v46, %v559_v49  ;;  %578 = vperm.xlu0 %1179, %v560_v48   ;;  %v572_v19 = vmul.f32 1.442695, %v566_v47 }
 0x1dc   : > { %v553_v53 = vpop.xlane.xlu0 %552 }
 0x1dd   : > { %v567_v54 = vsub.f32 %v1769_v46, %v563_v52  ;;  %745 = vst.msk [vmem:[#allocation2 + $0x18] sm:$0xff] %vm407_vm1, %v563_v52  ;;  %v561_v55 = vmax.f32 %v544_v50, %v553_v53  ;;  %v568_v15 = vmul.f32 1.442695, %v564_v51  ;;  %v639_v51 = vld [vmem:[#allocation4 + $0x10] sm:$0xff] }
 0x1df   : > { %v565_v56 = vsub.f32 %v544_v50, %v561_v55  ;;  %743 = vst.msk [vmem:[#allocation2 + $0x8] sm:$0xff] %vm407_vm1, %v561_v55  ;;  %583 = vperm.xlu1 %1180, %v561_v55   ;;  %v574_v20 = vmul.f32 1.442695, %v567_v54  ;;  %v640_v54 = vld [vmem:[#allocation4 + $0x18] sm:$0xff] }
 0x1e1   : > { %v570_v18 = vmul.f32 1.442695, %v565_v56 }
 0x1e3   : > { %593 = vperm.xlu1 %1180, %v563_v52   ;;  %v637_v52 = vld [vmem:[#allocation4] sm:$0xff] }
 0x254   : > { %v589_v59 = vpop.permute.xlu1 %588 }
 0x255   : > { %v598_v60 = vsub.f32 %v541_v29, %v589_v59  ;;  %v609_v29 = vld [vmem:[#allocation3 + $0x8] sm:$0xff] }
 0x256   : > { %v579_v61 = vpop.permute.xlu0 %578  ;;  %v638_v59 = vld [vmem:[#allocation4 + $0x8] sm:$0xff] }
 0x257   : > { %v596_v62 = vsub.f32 %v539_v32, %v579_v61  ;;  %v604_v63 = vmul.f32 1.442695, %v598_v60 }
 0x259   : > { %v600_v0 = vmul.f32 1.442695, %v596_v62 }
 0x25a   : > { %v584_v1 = vpop.permute.xlu1 %583 }
 0x25b   : > { %1185 = vpow2.f32 %v600_v0  ;;  %v597_v2 = vsub.f32 %v540_v38, %v584_v1 }
 0x25c   : > { %1187 = vpow2.f32 %v604_v63 }
 0x25d   : > { %v602_v3 = vmul.f32 1.442695, %v597_v2 }
 0x25e   : > { %v594_v4 = vpop.permute.xlu1 %593 }
 0x25f   : > { %1189 = vpow2.f32 %v602_v3  ;;  %v599_v5 = vsub.f32 %v542_v35, %v594_v4  ;;  %v611_v35 = vld [vmem:[#allocation3 + $0x18] sm:$0xff] }
 0x261   : > { %v606_v6 = vmul.f32 1.442695, %v599_v5 }
 0x263   : > { %1191 = vpow2.f32 %v606_v6 }
 0x264   : > { %1193 = vpow2.f32 %v568_v15 }
 0x265   : > { %1195 = vpow2.f32 %v570_v18 }
 0x266   : > { %1197 = vpow2.f32 %v572_v19 }
 0x267   : > { %1199 = vpow2.f32 %v574_v20 }
 0x268   : > { %v1186_v7 = vpop.eup %1185 }
 0x269   : > { %v616_v8 = vsel %vm547_vm7, %v1186_v7, 0.0  ;;  %v1188_v9 = vpop.eup %1187 }
 0x26a   : > { %617 = vadd.xlane.f32.xlu1 %v616_v8  ;;  %v622_v12 = vsel %vm547_vm7, %v1188_v9, 0.0 }
 0x26c   : > { %v1190_v10 = vpop.eup %1189 }
 0x26d   : > { %v619_v11 = vsel %vm547_vm7, %v1190_v10, 0.0  ;;  %v665_v13 = vpack.c.bf16 %v1190_v10, %v1186_v7 }
 0x26e   : > { %620 = vadd.xlane.f32.xlu0 %v619_v11  ;;  %623 = vadd.xlane.f32.xlu1 %v622_v12 }
 0x26f   : > { %1049 = vmatprep.mubr.msk.bf16.mxu1 %vm547_vm7, %v665_v13 }
 0x270   : > { %v1192_v14 = vpop.eup %1191 }
 0x271   : > { %v625_v16 = vsel %vm547_vm7, %v1192_v14, 0.0  ;;  %v666_v17 = vpack.c.bf16 %v1192_v14, %v1188_v9  ;;  %v1194_v21 = vpop.eup %1193 }
 0x272   : > { %626 = vadd.xlane.f32.xlu1 %v625_v16  ;;  %v1196_v22 = vpop.eup %1195  ;;  %v612_v26 = vmul.f32 %v1194_v21, %v608_v25 }
 0x273   : > { %1050 = vmatmul.mubr.msk.bf16.vlgmr.msra.gmra.mxu1 %vm547_vm7, %v666_v17  ;;  %v1198_v23 = vpop.eup %1197  ;;  %v613_v32 = vmul.f32 %v1196_v22, %v609_v29 }
 0x274   : > { %v1200_v24 = vpop.eup %1199  ;;  %v614_v31 = vmul.f32 %v1198_v23, %v610_v28 }
 0x275   : > { %v615_v38 = vmul.f32 %v1200_v24, %v611_v35 }
 0x283   : > { %643 = vperm.xlu1 %1180, %v1194_v21  }
 0x284   : > { %648 = vperm.xlu0 %1179, %v1196_v22  }
 0x287   : > { %653 = vperm.xlu1 %1180, %v1198_v23  }
 0x28b   : > { %658 = vperm.xlu1 %1180, %v1200_v24  }
 0x2f3   : > { %v618_v27 = vpop.xlane.xlu1 %617 }
 0x2f4   : > { %v628_v30 = vadd.f32 %v618_v27, %v612_v26 }
 0x2f6   : > { %633 = vst.msk [vmem:[#allocation3] sm:$0xff] %vm407_vm1, %v628_v30 }
 0x2f7   : > { %v624_v33 = vpop.xlane.xlu1 %623  ;;  %v621_v34 = vpop.xlane.xlu0 %620 }
 0x2f8   : > { %v630_v36 = vadd.f32 %v624_v33, %v614_v31  ;;  %v629_v37 = vadd.f32 %v621_v34, %v613_v32 }
 0x2fa   : > { %635 = vst.msk [vmem:[#allocation3 + $0x10] sm:$0xff] %vm407_vm1, %v630_v36  ;;  %634 = vst.msk [vmem:[#allocation3 + $0x8] sm:$0xff] %vm407_vm1, %v629_v37 }
 0x2fb   : > { %v627_v39 = vpop.xlane.xlu1 %626 }
 0x2fc   : > { %v631_v40 = vadd.f32 %v627_v39, %v615_v38 }
 0x2fd   : > { %v749_v41 = vld [vmem:[#allocation3] sm:$0xff] }
 0x2fe   : > { %636 = vst.msk [vmem:[#allocation3 + $0x18] sm:$0xff] %vm407_vm1, %v631_v40  ;;  %1201 = vrcp.f32 %v749_v41 }
 0x2ff   : > { %v644_v49 = vpop.permute.xlu1 %643  ;;  %v649_v60 = vpop.permute.xlu0 %648 }
 0x300   : > { %v661_v57 = vmul.f32 %v644_v49, %v637_v52  ;;  %v662_v1 = vmul.f32 %v649_v60, %v638_v59 }
 0x301   : > { %v750_v42 = vld [vmem:[#allocation3 + $0x8] sm:$0xff]  ;;  %v751_v43 = vld [vmem:[#allocation3 + $0x10] sm:$0xff] }
 0x302   : > { %1203 = vrcp.f32 %v750_v42 }
 0x303   : > { %1205 = vrcp.f32 %v751_v43  ;;  %v654_v50 = vpop.permute.xlu1 %653 }
 0x304   : > { %v663_v53 = vmul.f32 %v654_v50, %v639_v51 }
 0x305   : > { %v752_v44 = vld [vmem:[#allocation3 + $0x18] sm:$0xff] }
 0x306   : > { %1207 = vrcp.f32 %v752_v44 }
 0x307   : > { %v659_v55 = vpop.permute.xlu1 %658 }
 0x308   : > { %v664_v62 = vmul.f32 %v659_v55, %v640_v54 }
 0x30b   : > { %v1202_v45 = vpop.eup %1201 }
 0x30c   : > { %763 = vperm.xlu1 %1180, %v1202_v45  }
 0x30f   : > { %v1204_v46 = vpop.eup %1203 }
 0x310   : > { %v1206_v47 = vpop.eup %1205  ;;  %768 = vperm.xlu0 %1179, %v1204_v46  }
 0x311   : > { %773 = vperm.xlu1 %1180, %v1206_v47  }
 0x313   : > { %v1208_v48 = vpop.eup %1207 }
 0x314   : > { %778 = vperm.xlu0 %1179, %v1208_v48  }
 0x333   : > { %v1051_v56 = vpop.f32.mrf.mxu1 }
 0x334   : > { %v736_v58 = vadd.f32 %v1051_v56, %v663_v53 }
 0x335   : > { %v719_v61 = vpop.f32.mrf.mxu1 }
 0x336   : > { %740 = vst.msk [vmem:[#allocation4 + $0x10] sm:$0xff] %vm416_vm0, %v736_v58  ;;  %v734_v63 = vadd.f32 %v719_v61, %v661_v57 }
 0x337   : > { %v1052_v0 = vpop.f32.mrf.mxu1 }
 0x338   : > { %738 = vst.msk [vmem:[#allocation4] sm:$0xff] %vm416_vm0, %v734_v63  ;;  %v737_v2 = vadd.f32 %v1052_v0, %v664_v62 }
 0x339   : > { %v722_v3 = vpop.f32.mrf.mxu1 }
 0x33a   : > { %741 = vst.msk [vmem:[#allocation4 + $0x18] sm:$0xff] %vm416_vm0, %v737_v2  ;;  %v735_v4 = vadd.f32 %v722_v3, %v662_v1 }
 0x33c   : > { %739 = vst.msk [vmem:[#allocation4 + $0x8] sm:$0xff] %vm416_vm0, %v735_v4 }
 0x33d   : > { %v759_v11 = vld [vmem:[#allocation4 + $0x10] sm:$0xff] }
 0x33f   : > { %v757_v5 = vld [vmem:[#allocation4] sm:$0xff] }
 0x341   : > { %v760_v15 = vld [vmem:[#allocation4 + $0x18] sm:$0xff] }
 0x343   : > { %v758_v8 = vld [vmem:[#allocation4 + $0x8] sm:$0xff] }
 0x387   : > { %v764_v6 = vpop.permute.xlu1 %763 }
 0x388   : > { %v781_v7 = vmul.f32 %v764_v6, %v757_v5 }
 0x38a   : > { %785 = vst.msk [vmem:[%s393_s1] sm:$0xff] %vm416_vm0, %v781_v7 }
 0x38b   : > { %v769_v9 = vpop.permute.xlu0 %768 }
 0x38c   : > { %v782_v10 = vmul.f32 %v769_v9, %v758_v8  ;;  %v774_v12 = vpop.permute.xlu1 %773 }
 0x38d   : > { %v783_v13 = vmul.f32 %v774_v12, %v759_v11 }
 0x38e   : > { %786 = vst.msk [vmem:[%s393_s1 + $0x8] sm:$0xff] %vm416_vm0, %v782_v10 }
 0x38f   : > { %787 = vst.msk [vmem:[%s393_s1 + $0x10] sm:$0xff] %vm416_vm0, %v783_v13  ;;  %v779_v14 = vpop.permute.xlu0 %778 }
 0x390   : > { %v784_v16 = vmul.f32 %v779_v14, %v760_v15 }
 0x392   : > { %788 = vst.msk [vmem:[%s393_s1 + $0x18] sm:$0xff] %vm416_vm0, %v784_v16 }
 0x393   : > { %1334 = shalt.err (!%p1331_p13)
}
 0x394   : > { %s1335_s13 = scalar_lea.hbm %s1807_s30, 512  ;;  %s1339_s11 = scalar_lea.hbm %s1918_s10, 4096 }
 0x395   : > { %p1336_p6 = scmp.ne.s32.totalorder %s1807_s30, %s1335_s13  ;;  %p1340_p5 = scmp.lt.s32.totalorder %s1807_s30, %s1918_s10 }
 0x396   : > { %p1341_p12 = scmp.lt.s32.totalorder %s1339_s11, %s1335_s13 }
 0x397   : > { %p1337_p3 = pnand %p1336_p6, %p1919_p9 }
 0x398   : > { %p1342_p0 = por %p1341_p12, %p1340_p5 }
 0x399   : > { %p1338_p7 = pneg %p1337_p3 }
 0x39b   : > { %p1343_p8 = pnand %p1342_p0, %p1338_p7 }
 0x39d   : > { %1346 = shalt.err (!%p1343_p8)
}
 0x39e   : > { %s1461_s8 = smov 128   ;;  %s1462_s1 = smov 8  }
 0x39f   : > { %1063 = dma.vmem_to_hbm [thread:$0]  (%p1919_p9), %s1800_s3, 512, %s1807_s30, %s790_s4, %s1461_s8, %s1461_s8, %s1462_s1  }
 0x3a0 PF: > { %s1920_s22 = sld [smem:[#allocation24_spill]]  ;;  %p1083_p2 = scmp.ge.s32.totalorder %s1449_s25, 2 }
 0x3a1   : > { %s822_s6 = sand.u32 1, %s1421_s18  }
 0x3a2   : > { %s823_s12 = scalar_lea.sflag [#allocation7], %s822_s6 }
 0x3a6   : > { %p1921_p11 = scmp.ne.s32.totalorder %s1920_s22, 0 }
 0x3a8   : > { %p1079_p1 = pnand %p1083_p2, %p1921_p11 }
 0x3aa   : > { %p1080_p4 = pneg %p1079_p1 }
 0x3ac   : > { %1404 = dma.done.wait (%p1080_p4), %s823_s12, 512  }
 0x3ad   : > { %1406 = vsyncadd (%p1080_p4), %s823_s12, 4294966784  ;;  %s26_s25 = sadd.s32 1, %s1449_s25   ;;  %s1922_s27 = sld [smem:[#allocation25_spill]] }
 0x3ae   : > { %p23_p10 = scmp.ge.s32.totalorder %s26_s25, 10   ;;  %s1923_s21 = sld [smem:[#allocation20_spill]] }
 0x3af   : > { %s1924_s23 = sld [smem:[#allocation21_spill]]  ;;  %s1926_s15 = smov %s1413_s16 }
 0x3b0   : > { %s1925_s3 = sld [smem:[#allocation22_spill]]  ;;  %s1927_s16 = smov %s1417_s17 }
 0x3b1   : > { %s1928_s17 = smov %s1675_s14  ;;  %s1929_s18 = smov %s1425_s19 }
 0x3b2   : > { %s1930_s19 = smov %s1429_s20  ;;  %s1932_s22 = smov %s1445_s24 }
 0x3b3   : > { %s1931_s20 = smov %s1922_s27  ;;  %25 = sbr.rel (!%p23_p10) target bundleno = 17 (0x11), region = 126 }
 0x3b6   : > { %s1933_s24 = smov %s1925_s3 }
 0x3b8   :  { %828 = vsyncpa [#allocation6], 1 }
 0x3b9   :  { %830 = vsyncpa [#allocation6 + $0x1], 1 }
 0x3ba   :  { %831 = vsyncpa [#allocation9], 1 }
 0x3bb   :  { %833 = vsyncpa [#allocation9 + $0x1], 1 }
 0x3bc   :  { %834 = vsyncpa [#allocation12], 1 }
 0x3bd   :  { %836 = vsyncpa [#allocation12 + $0x1], 1 }
 0x3be   :  { %837 = vsyncpa [#allocation7], 1 }
 0x3bf   :  { %839 = vsyncpa [#allocation7 + $0x1], 1 }

</bundles_post_ra>
